<compile_context>
chip_gen: v7x
topology: tpu7x:2x2x1
jax: 0.10.0
libtpu: 0.0.40
codegen_flags: <defaults>
</compile_context>

<pallas_src>
from functools import partial

import jax
import jax.numpy as jnp
from jax.experimental import pallas as pl
from jax.experimental.pallas import tpu as pltpu


def _round_up(v, m):
    return ((v + m - 1) // m) * m


# ----------------------------------------------------------------------------
# Kernel bodies
# ----------------------------------------------------------------------------
def _attention_body(x, w, b, u, t_valid):
    # x: (TB, T_pad, H) f32/bf16, w: (H, A) f32, b: (1, A) f32, u: (1, A) f32
    TB, T_pad, H = x.shape
    A = w.shape[1]

    # Upcast the x tile once in VMEM; all math stays f32 (v5e has no bf16 VPU).
    xf = x.astype(jnp.float32)

    # v = tanh(x @ W + b): a single 2-D MXU matmul. T_pad is always a multiple
    # of 8 (the wrapper pads), so this reshape is a free sublane re-tiling.
    v = jnp.tanh(
        jnp.dot(xf.reshape(TB * T_pad, H), w, preferred_element_type=jnp.float32) + b
    )                                                          # (TB*T_pad, A)

    # vu = <v, u> over the attention axis: VPU multiply + cross-lane reduce,
    # avoiding a 1-lane-wide MXU matmul with masked result stores.
    vu = jnp.sum(v.reshape(TB, T_pad, A) * u, axis=-1)         # (TB, T_pad)

    # Softmax over the (valid part of the) sequence axis. No max-subtraction,
    # matching the torch reference exactly; exact division (no approx
    # reciprocal) to stay bit-close to the reference.
    exps = jnp.exp(vu)                                         # (TB, T_pad)
    if t_valid != T_pad:
        # Padded timesteps must not contribute to the denominator.
        pos = jax.lax.broadcasted_iota(jnp.int32, (TB, T_pad), 1)
        exps = jnp.where(pos < t_valid, exps, 0.0)
    denom = jnp.sum(exps, axis=-1, keepdims=True)              # (TB, 1)
    alphas = exps / denom                                      # (TB, T_pad)

    # output = sum_T (x * alphas[..., None]) -> (TB, H). Padded timesteps of x
    # are zero, so they do not pollute the weighted sum.
    out = jnp.sum(xf * alphas[:, :, None], axis=1)             # (TB, H)
    return out, alphas


def _attention_kernel(x_ref, w_ref, b_ref, u_ref, out_ref, *, t_valid):
    out, _ = _attention_body(x_ref[...], w_ref[...], b_ref[...], u_ref[...], t_valid)
    out_ref[...] = out


def _attention_kernel_with_alphas(x_ref, w_ref, b_ref, u_ref, out_ref, alphas_ref,
                                  *, t_valid):
    out, alphas = _attention_body(x_ref[...], w_ref[...], b_ref[...], u_ref[...],
                                  t_valid)
    out_ref[...] = out
    # NOTE: (TB, T) with T << 128 lowers to lane-sparse masked stores; this is
    # acceptable because alphas writeback is ~1/H of the x read traffic.
    alphas_ref[...] = alphas


# ----------------------------------------------------------------------------
# VMEM budgeting + pallas_call builder + wrapper
# ----------------------------------------------------------------------------
def _vmem_budgets():
    """Generation-aware (tile_budget_bytes, vmem_limit_bytes)."""
    try:
        cap = pltpu.get_tpu_info().vmem_capacity_bytes
    except Exception:
        cap = 64 << 20                       # conservative (v7x-sized) default
    if cap >= (96 << 20):                    # v5e / v6e: 128 MiB physical VMEM
        return 48 << 20, 96 << 20
    return 20 << 20, 44 << 20                # v7x: 64 MiB per TensorCore


def _build_call(B_pad, T_pad, H, A, TB, r_alphas, t_valid, vmem_limit):
    grid = (B_pad // TB,)
    in_specs = [
        pl.BlockSpec((TB, T_pad, H), lambda i: (i, 0, 0)),   # x: batch-tiled
        pl.BlockSpec((H, A), lambda i: (0, 0)),              # W: VMEM-resident
        pl.BlockSpec((1, A), lambda i: (0, 0)),              # b: resident
        pl.BlockSpec((1, A), lambda i: (0, 0)),              # u: resident
    ]
    out_spec = pl.BlockSpec((TB, H), lambda i: (i, 0))
    cparams = pltpu.CompilerParams(
        # Batch tiles are fully independent.
        dimension_semantics=("parallel",),
        vmem_limit_bytes=vmem_limit,
    )
    if r_alphas:
        return pl.pallas_call(
            partial(_attention_kernel_with_alphas, t_valid=t_valid),
            out_shape=(
                jax.ShapeDtypeStruct((B_pad, H), jnp.float32),
                jax.ShapeDtypeStruct((B_pad, T_pad), jnp.float32),
            ),
            grid=grid,
            in_specs=in_specs,
            out_specs=(out_spec, pl.BlockSpec((TB, T_pad), lambda i: (i, 0))),
            compiler_params=cparams,
        )
    return pl.pallas_call(
        partial(_attention_kernel, t_valid=t_valid),
        out_shape=jax.ShapeDtypeStruct((B_pad, H), jnp.float32),
        grid=grid,
        in_specs=in_specs,
        out_specs=out_spec,
        compiler_params=cparams,
    )


def attention_layer(x, W_omega, b_omega, u_omega, r_alphas=False, block_b=None):
    """Pallas implementation of AttentionLayer.forward.

    x:        (batch, seq_len, hidden) float32 or bfloat16
    W_omega:  (hidden, attn) float32
    b_omega:  (attn,) float32
    u_omega:  (attn,) float32
    """
    x = jnp.asarray(x)
    if x.dtype not in (jnp.float32, jnp.bfloat16):
        x = x.astype(jnp.float32)
    B, T, H = x.shape
    A = W_omega.shape[-1]
    W = jnp.asarray(W_omega, jnp.float32)
    b2d = jnp.asarray(b_omega, jnp.float32).reshape(1, A)
    u2d = jnp.asarray(u_omega, jnp.float32).reshape(1, A)

    # Pad T to a multiple of 8 so the in-kernel reshape is layout-free; the
    # kernel masks padded timesteps out of the softmax denominator.
    T_pad = max(8, _round_up(T, 8))
    x_itemsize = x.dtype.itemsize
    tile_budget, vmem_limit = _vmem_budgets()

    # Pick the batch tile so double-buffered x tiles + the f32 upcast copy +
    # the (TB,T,H) x*alphas temporary + tanh intermediates + double-buffered
    # outputs stay under the generation-specific budget.
    if block_b is None:
        per_row_bytes = (
            2 * T_pad * H * x_itemsize     # double-buffered x input tile
            + 2 * T_pad * H * 4            # f32 upcast + (x * alphas) temporary
            + 2 * T_pad * A * 4            # tanh / v intermediates
            + 2 * (H + T_pad) * 4          # double-buffered out (+ alphas) tiles
        )
        block_b = max(1, tile_budget // max(per_row_bytes, 1))

    if block_b >= B:
        if B >= 16:
            # Still split into >=2 tiles so input prefetch of tile i+1 overlaps
            # compute/writeback of tile i (software pipelining).
            TB = min(_round_up(B, 8), max(8, _round_up(pl.cdiv(B, 4), 8)))
        else:
            TB = B                         # too small to split without big padding
    else:
        TB = max(8, (block_b // 8) * 8)    # sublane-aligned batch tiles

    B_pad = pl.cdiv(B, TB) * TB
    pad_b, pad_t = B_pad - B, T_pad - T
    if pad_b or pad_t:
        x_p = jnp.pad(x, ((0, pad_b), (0, pad_t), (0, 0)))
    else:
        x_p = x

    call = _build_call(B_pad, T_pad, H, A, TB, r_alphas, T, vmem_limit)
    if r_alphas:
        out, alphas = call(x_p, W, b2d, u2d)
        return out[:B], alphas[:B, :T]
    out = call(x_p, W, b2d, u2d)
    return out[:B]


# ----------------------------------------------------------------------------
# Pure-JAX reference of the PyTorch forward
# ----------------------------------------------------------------------------
def _reference(x, W, b, u):
    x = jnp.asarray(x, jnp.float32)
    B, T, H = x.shape
    v = jnp.tanh(x.reshape(B * T, H) @ W + b.reshape(1, -1))
    vu = v @ u.reshape(-1, 1)
    exps = jnp.exp(vu).reshape(B, T)
    alphas = exps / jnp.sum(exps, axis=1, keepdims=True)
    out = jnp.sum(x * alphas[:, :, None], axis=1)
    return out, alphas


if __name__ == "__main__":
    key = jax.random.PRNGKey(0)
    k_x, k_w, k_b, k_u, k_x2, k_x3 = jax.random.split(key, 6)

    batch = 2
    seq_len = 8
    hidden_size = 32
    attention_size = 32

    # Deterministic inputs / parameters (params ~ N(0, 0.1) like nn.init.normal_)
    x = jax.random.normal(k_x, (batch, seq_len, hidden_size), dtype=jnp.float32)
    W_omega = 0.1 * jax.random.normal(k_w, (hidden_size, attention_size), dtype=jnp.float32)
    b_omega = 0.1 * jax.random.normal(k_b, (attention_size,), dtype=jnp.float32)
    u_omega = 0.1 * jax.random.normal(k_u, (attention_size,), dtype=jnp.float32)

    # --- small config, alphas requested (single-tile path) ---------------------
    out, alphas = attention_layer(x, W_omega, b_omega, u_omega, r_alphas=True)
    out = jax.block_until_ready(out)
    alphas = jax.block_until_ready(alphas)
    ref_out, ref_alphas = _reference(x, W_omega, b_omega, u_omega)
    assert out.shape == (batch, hidden_size)
    assert alphas.shape == (batch, seq_len)
    assert jnp.allclose(out, ref_out, atol=1e-4, rtol=1e-4), "output mismatch"
    assert jnp.allclose(alphas, ref_alphas, atol=1e-4, rtol=1e-4), "alphas mismatch"

    # --- batch-tiled / padded multi-step grid path (grid > 1, parallel axis) ---
    batch2 = 20
    x2 = jax.random.normal(k_x2, (batch2, seq_len, hidden_size), dtype=jnp.float32)
    out2 = attention_layer(x2, W_omega, b_omega, u_omega, r_alphas=False, block_b=8)
    out2 = jax.block_until_ready(out2)
    ref_out2, _ = _reference(x2, W_omega, b_omega, u_omega)
    assert out2.shape == (batch2, hidden_size)
    assert jnp.allclose(out2, ref_out2, atol=1e-4, rtol=1e-4), "tiled output mismatch"

    # --- seq_len not a multiple of 8 (T padded to 16, softmax masking path) ----
    seq_len3 = 12
    x3 = jax.random.normal(k_x3, (batch, seq_len3, hidden_size), dtype=jnp.float32)
    out3, alphas3 = attention_layer(x3, W_omega, b_omega, u_omega, r_alphas=True)
    out3 = jax.block_until_ready(out3)
    ref_out3, ref_alphas3 = _reference(x3, W_omega, b_omega, u_omega)
    assert out3.shape == (batch, hidden_size)
    assert alphas3.shape == (batch, seq_len3)
    assert jnp.allclose(out3, ref_out3, atol=1e-4, rtol=1e-4), "T-padded output mismatch"
    assert jnp.allclose(alphas3, ref_alphas3, atol=1e-4, rtol=1e-4), "T-padded alphas mismatch"

    # --- bf16 x input (halved HBM reads; math still f32 inside the kernel) -----
    x_bf16 = x.astype(jnp.bfloat16)
    out_bf = attention_layer(x_bf16, W_omega, b_omega, u_omega, r_alphas=False)
    out_bf = jax.block_until_ready(out_bf)
    ref_out_bf, _ = _reference(x_bf16.astype(jnp.float32), W_omega, b_omega, u_omega)
    assert jnp.allclose(out_bf, ref_out_bf, atol=1e-4, rtol=1e-4), "bf16 output mismatch"

    print("KERNEL_OK")
</pallas_src>

<mosaic_0001>
module attributes {stable_mosaic.version = 11 : i64} {
  func.func @_attention_kernel_with_alphas(%arg0: i32, %arg1: memref<2x8x32xf32, #tpu.memory_space<vmem>>, %arg2: memref<32x32xf32, #tpu.memory_space<vmem>>, %arg3: memref<1x32xf32, #tpu.memory_space<vmem>>, %arg4: memref<1x32xf32, #tpu.memory_space<vmem>>, %arg5: memref<2x32xf32, #tpu.memory_space<vmem>>, %arg6: memref<2x8xf32, #tpu.memory_space<vmem>>) attributes {dimension_semantics = [#tpu.dimension_semantics<parallel>], iteration_bounds = array<i64: 1>, scalar_prefetch = 0 : i64, scratch_operands = 0 : i64, tpu.core_type = #tpu.core_type<tc>, window_params = [{transform_indices = @transform_0, window_bounds = array<i64: 2, 8, 32>}, {pipeline_mode = #tpu.pipeline_mode<synchronous>, transform_indices = @transform_1, window_bounds = array<i64: 32, 32>}, {pipeline_mode = #tpu.pipeline_mode<synchronous>, transform_indices = @transform_2, window_bounds = array<i64: 1, 32>}, {pipeline_mode = #tpu.pipeline_mode<synchronous>, transform_indices = @transform_3, window_bounds = array<i64: 1, 32>}, {transform_indices = @transform_4, window_bounds = array<i64: 2, 32>}, {transform_indices = @transform_5, window_bounds = array<i64: 2, 8>}]} {
    %c0 = arith.constant 0 : index
    %c0_0 = arith.constant 0 : index
    %c0_1 = arith.constant 0 : index
    %0 = vector.load %arg1[%c0, %c0_0, %c0_1] : memref<2x8x32xf32, #tpu.memory_space<vmem>>, vector<2x8x32xf32>
    %c0_2 = arith.constant 0 : index
    %c0_3 = arith.constant 0 : index
    %1 = vector.load %arg2[%c0_2, %c0_3] : memref<32x32xf32, #tpu.memory_space<vmem>>, vector<32x32xf32>
    %c0_4 = arith.constant 0 : index
    %c0_5 = arith.constant 0 : index
    %2 = vector.load %arg3[%c0_4, %c0_5] : memref<1x32xf32, #tpu.memory_space<vmem>>, vector<1x32xf32>
    %c0_6 = arith.constant 0 : index
    %c0_7 = arith.constant 0 : index
    %3 = vector.load %arg4[%c0_6, %c0_7] : memref<1x32xf32, #tpu.memory_space<vmem>>, vector<1x32xf32>
    %4 = vector.shape_cast %0 : vector<2x8x32xf32> to vector<16x32xf32>
    %cst = arith.constant dense<0.000000e+00> : vector<16x32xf32>
    %5 = tpu.matmul %4, %1, %cst {dimension_numbers = #tpu.dot_dimension_numbers<[1], [0], [0], [1], [0, 0, 1, 1], [], []>} : vector<16x32xf32>, vector<32x32xf32>, vector<16x32xf32> -> vector<16x32xf32>
    %6 = vector.broadcast %2 : vector<1x32xf32> to vector<16x32xf32>
    %7 = arith.addf %5, %6 : vector<16x32xf32>
    %8 = math.tanh %7 : vector<16x32xf32>
    %9 = vector.shape_cast %8 : vector<16x32xf32> to vector<2x8x32xf32>
    %10 = vector.shape_cast %3 : vector<1x32xf32> to vector<1x1x32xf32>
    %11 = vector.broadcast %10 : vector<1x1x32xf32> to vector<2x8x32xf32>
    %12 = arith.mulf %9, %11 : vector<2x8x32xf32>
    %cst_8 = arith.constant dense<0.000000e+00> : vector<2x8xf32>
    %13 = vector.multi_reduction <add>, %12, %cst_8 [2] : vector<2x8x32xf32> to vector<2x8xf32>
    %14 = math.exp %13 : vector<2x8xf32>
    %cst_9 = arith.constant dense<0.000000e+00> : vector<2xf32>
    %15 = vector.multi_reduction <add>, %14, %cst_9 [1] : vector<2x8xf32> to vector<2xf32>
    %16 = vector.shape_cast %15 : vector<2xf32> to vector<2x1xf32>
    %17 = vector.broadcast %16 : vector<2x1xf32> to vector<2x8xf32>
    %18 = arith.divf %14, %17 : vector<2x8xf32>
    %19 = vector.shape_cast %18 : vector<2x8xf32> to vector<2x8x1xf32>
    %20 = vector.broadcast %19 : vector<2x8x1xf32> to vector<2x8x32xf32>
    %21 = arith.mulf %0, %20 : vector<2x8x32xf32>
    %cst_10 = arith.constant dense<0.000000e+00> : vector<2x32xf32>
    %22 = vector.multi_reduction <add>, %21, %cst_10 [1] : vector<2x8x32xf32> to vector<2x32xf32>
    %c0_11 = arith.constant 0 : index
    %c0_12 = arith.constant 0 : index
    %23 = vector.load %arg5[%c0_11, %c0_12] : memref<2x32xf32, #tpu.memory_space<vmem>>, vector<2x32xf32>
    tpu.vector_store %arg5[%c0_11, %c0_12], %22 {strides = array<i32>} : memref<2x32xf32, #tpu.memory_space<vmem>>, vector<2x32xf32>,
    %c0_13 = arith.constant 0 : index
    %c0_14 = arith.constant 0 : index
    %24 = vector.load %arg6[%c0_13, %c0_14] : memref<2x8xf32, #tpu.memory_space<vmem>>, vector<2x8xf32>
    tpu.vector_store %arg6[%c0_13, %c0_14], %18 {strides = array<i32>} : memref<2x8xf32, #tpu.memory_space<vmem>>, vector<2x8xf32>,
    return
  }
  func.func @transform_0(%arg0: i32) -> (i32, i32, i32) {
    %c0_i32 = arith.constant 0 : i32
    %c0_i32_0 = arith.constant 0 : i32
    %c0_i32_1 = arith.constant 0 : i32
    return %arg0, %c0_i32, %c0_i32_0 : i32, i32, i32
  }
  func.func @transform_1(%arg0: i32) -> (i32, i32) {
    %c0_i32 = arith.constant 0 : i32
    %c0_i32_0 = arith.constant 0 : i32
    %c0_i32_1 = arith.constant 0 : i32
    return %c0_i32, %c0_i32_0 : i32, i32
  }
  func.func @transform_2(%arg0: i32) -> (i32, i32) {
    %c0_i32 = arith.constant 0 : i32
    %c0_i32_0 = arith.constant 0 : i32
    %c0_i32_1 = arith.constant 0 : i32
    return %c0_i32, %c0_i32_0 : i32, i32
  }
  func.func @transform_3(%arg0: i32) -> (i32, i32) {
    %c0_i32 = arith.constant 0 : i32
    %c0_i32_0 = arith.constant 0 : i32
    %c0_i32_1 = arith.constant 0 : i32
    return %c0_i32, %c0_i32_0 : i32, i32
  }
  func.func @transform_4(%arg0: i32) -> (i32, i32) {
    %c0_i32 = arith.constant 0 : i32
    %c0_i32_0 = arith.constant 0 : i32
    return %arg0, %c0_i32 : i32, i32
  }
  func.func @transform_5(%arg0: i32) -> (i32, i32) {
    %c0_i32 = arith.constant 0 : i32
    %c0_i32_0 = arith.constant 0 : i32
    return %arg0, %c0_i32 : i32, i32
  }
}

</mosaic_0001>

<bundles_post_ra>
// kernel: tpu_custom_call.1
= control target key start
LH: loop header
LB: loop body
LE: loop exit
PB: predicated region body
PF: predicated region fallthrough
CT: control target
= control target key end

     0   :  { %11 = vsyncpa [#allocation3], 0  ;;  %s524_s0 = inlined_call_operand.hbm [shape: f32[2,8,32], index: 0, kind: input, shape index: {}]   ;;  %s525_s1 = inlined_call_operand.hbm [shape: f32[32,32], index: 1, kind: input, shape index: {}]   ;;  %s526_s2 = inlined_call_operand.vmem [shape: f32[1,32], index: 2, kind: input, shape index: {}]   ;;  %s527_s3 = inlined_call_operand.vmem [shape: f32[1,32], index: 3, kind: input, shape index: {}]   ;;  %s528_s4 = inlined_call_operand.hbm [shape: f32[2,32], index: 4, kind: output, shape index: {0}]   ;;  %s529_s5 = inlined_call_operand.hbm [shape: f32[2,8], index: 5, kind: output, shape index: {1}]  }
   0x1   :  { %12 = vsyncpa [#allocation6], 0 }
   0x2   :  { %13 = vsyncpa [#allocation4], 0 }
   0x3   :  { %14 = vsyncpa [#allocation9], 0  ;;  %s418_s18 = smov [#allocation2]   ;;  %s322_s22 = scalar_lea.hbm %s524_s0, 256 }
   0x4   :  { %s20_s19 = sshll.u32 %s418_s18, 4  ;;  %p323_p0 = scmp.ne.s32.totalorder %s524_s0, %s322_s22  ;;  %s21_s19 = int_to_ptr.vmem [resolvable:$true] %s20_s19 }
   0x5   :  { %p326_p1 = scmp.lt.u32.totalorder %s322_s22, %s524_s0 }
   0x7   :  { %p328_p2 = pnand %p326_p1, %p323_p0 }
   0x9   :  { %331 = shalt.err (!%p328_p2)
}
   0xa   :  { %s332_s27 = scalar_lea.vmem %s21_s19, 256  ;;  %p337_p4 = scmp.lt.s32.totalorder %s21_s19, %s21_s19 }
   0xb   :  { %p333_p3 = scmp.ne.s32.totalorder %s21_s19, %s332_s27  ;;  %p338_p5 = scmp.lt.s32.totalorder %s332_s27, %s332_s27 }
   0xd   :  { %p339_p6 = por %p338_p5, %p337_p4 }
   0xf   :  { %p340_p7 = pnand %p339_p6, %p333_p3 }
  0x11   :  { %343 = shalt.err (!%p340_p7)
}
  0x12   :  { %s419_s28 = smov 128   ;;  %s420_s29 = smov 8  }
  0x13   :  { %26 = dma.hbm_to_vmem [thread:$0]  %s524_s0, 256, %s21_s19, [#allocation3], %s419_s28, %s419_s28, %s420_s29  }
  0x14   :  { %s421_s7 = smov [#allocation5]   ;;  %s344_s11 = scalar_lea.hbm %s525_s1, 512 }
  0x15   :  { %s32_s8 = sshll.u32 %s421_s7, 4  ;;  %p345_p8 = scmp.ne.s32.totalorder %s525_s1, %s344_s11  ;;  %s33_s8 = int_to_ptr.vmem [resolvable:$true] %s32_s8 }
  0x16   :  { %p348_p9 = scmp.lt.u32.totalorder %s344_s11, %s525_s1 }
  0x18   :  { %p350_p10 = pnand %p348_p9, %p345_p8 }
  0x1a   :  { %353 = shalt.err (!%p350_p10)
}
  0x1b   :  { %s354_s16 = scalar_lea.vmem %s33_s8, 512  ;;  %p359_p12 = scmp.lt.s32.totalorder %s33_s8, %s33_s8 }
  0x1c   :  { %p355_p11 = scmp.ne.s32.totalorder %s33_s8, %s354_s16  ;;  %p360_p13 = scmp.lt.s32.totalorder %s354_s16, %s354_s16 }
  0x1e   :  { %p361_p0 = por %p360_p13, %p359_p12 }
  0x20   :  { %p362_p1 = pnand %p361_p0, %p355_p11 }
  0x22   :  { %365 = shalt.err (!%p362_p1)
}
  0x23   :  { %38 = dma.hbm_to_vmem [thread:$0]  %s525_s1, 512, %s33_s8, [#allocation6], %s419_s28, %s419_s28, %s420_s29  }
  0x24   :  { %410 = dma.done.wait [#allocation3], 256  }
  0x25   :  { %411 = vsyncadd [#allocation3], 4294967040 }
  0x26   :  { %412 = dma.done.wait [#allocation6], 512  }
  0x27   :  { %413 = vsyncadd [#allocation6], 4294966784  ;;  %vm63_vm0 = vcmask 261120   ;;  %v51_v0 = vld [vmem:[#allocation5] sm:$0xff]  ;;  %v52_v1 = vld [vmem:[#allocation5 + $0x8] sm:$0xff]  ;;  %v167_v24 = vlaneseq  ;;  %vm177_vm1 = vcmask 1041409  }
  0x28   :  { %v53_v2 = vld [vmem:[#allocation5 + $0x10] sm:$0xff]  ;;  %v293_v3 = vpack.c.bf16 %v52_v1, %v51_v0  ;;  %v54_v4 = vld [vmem:[#allocation5 + $0x18] sm:$0xff]  ;;  %vm180_vm2 = vcmask 58368   ;;  %v422_v34 = vmov 0  }
  0x29   :  { %v479_v5 = vld [vmem:[#allocation2] sm:$0xff]  ;;  %v297_v6 = vpack.c.bf16 %v54_v4, %v53_v2  ;;  %v50_v7 = vld [vmem:[#allocation2 + $0x8] sm:$0xff]  ;;  %v168_v25 = vand.u32 127, %v167_v24  ;;  %v170_v26 = vshrl.u32 %v167_v24, 7  ;;  %309 = vset.pattern.permute.xlu0 %v422_v34  ;;  %308 = vset.pattern.permute.xlu1 %v422_v34 }
  0x2a   :  { %290 = vmatprep.mubr.msk.f32.mxu0 %vm63_vm0, %v479_v5  ;;  %294 = vmatprep.subr.bf16.mxu0 %v293_v3  ;;  %v272_v8 = vld [vmem:[%s526_s2] ss:$0 sm:$0xff]  ;;  %s423_s2 = smov [#allocation8]  }
  0x2b   :  { %296 = vmatpush3.bf16.msra.mxu0 %v293_v3  ;;  %v275_v13 = vld [vmem:[%s527_s3] ss:$0 sm:$0xff]  ;;  %v171_v27 = vsub.s32 %v168_v25, %v170_v26  ;;  %v187_v35 = vsub.s32 0, %v170_v26  ;;  %v191_v36 = vsub.s32 1, %v170_v26  ;;  %s258_s3 = sshll.u32 %s423_s2, 4  ;;  %s259_s3 = int_to_ptr.vmem [resolvable:$true] %s258_s3 }
  0x2c   :  { %298 = vmatprep.subr.bf16.mxu0 %v297_v6  ;;  %s366_s21 = scalar_lea.vmem %s259_s3, 32  ;;  %p371_p3 = scmp.lt.s32.totalorder %s259_s3, %s259_s3 }
  0x2d   :  { %p367_p2 = scmp.ne.s32.totalorder %s259_s3, %s366_s21  ;;  %p372_p4 = scmp.lt.s32.totalorder %s366_s21, %s366_s21 }
  0x2f   :  { %300 = vmatpush3.bf16.msra.mxu0 %v297_v6  ;;  %p373_p5 = por %p372_p4, %p371_p3 }
  0x31   :  { %p374_p6 = pnand %p373_p5, %p367_p2 }
  0x32   :  { %291 = vmatmul.mubr.msk.f32.vlgmr.msra.gmra.mrb[0].mxu0 %vm63_vm0, %v50_v7 }
 0x105   :  { %v292_v9 = vpop.f32.mrb[0].mxu0 }
 0x106   :  { %v142_v10 = vadd.f32 %v292_v9, %v272_v8  ;;  %v136_v11 = vpop.f32.mrb[1].mxu0 }
 0x107   :  { %v137_v12 = vadd.f32 %v272_v8, %v136_v11 }
 0x108   :  { %310 = vtanh.f32 %v142_v10 }
 0x109   :  { %312 = vtanh.f32 %v137_v12 }
 0x112   :  { %v311_v14 = vpop.eup %310 }
 0x113   :  { %v313_v15 = vpop.eup %312  ;;  %v154_v18 = vmul.f32 %v311_v14, %v275_v13 }
 0x114   :  { %v153_v16 = vmul.f32 %v313_v15, %v275_v13 }
 0x115   :  { %v158_v19 = vsel %vm63_vm0, %v154_v18, 0.0 }
 0x116   :  { %v155_v17 = vsel %vm63_vm0, %v153_v16, 0.0 }
 0x117   :  { %156 = vadd.xlane.f32.xlu0 %v155_v17 }
 0x11b   :  { %159 = vadd.xlane.f32.xlu0 %v158_v19 }
 0x1a4   :  { %v157_v20 = vpop.xlane.xlu0 %156 }
 0x1a5   :  { %v161_v21 = vmul.f32 1.442695, %v157_v20 }
 0x1a7   :  { %314 = vpow2.f32 %v161_v21 }
 0x1a8   :  { %v160_v22 = vpop.xlane.xlu0 %159 }
 0x1a9   :  { %v163_v23 = vmul.f32 1.442695, %v160_v22 }
 0x1ab   :  { %316 = vpow2.f32 %v163_v23 }
 0x1b1   :  { %v315_v28 = vpop.eup %314 }
 0x1b2   :  { %v172_v30 = vrot.slane %v315_v28, %v171_v27 }
 0x1b5   :  { %v317_v29 = vpop.eup %316 }
 0x1b6   :  { %v176_v31 = vrot.slane %v317_v29, %v171_v27 }
 0x1b8   :  { %v178_v32 = vsel %vm177_vm1, %v176_v31, %v172_v30 }
 0x1b9   :  { %v181_v33 = vsel %vm180_vm2, %v178_v32, 0.0 }
 0x1ba   :  { %182 = vadd.xlane.f32.xlu1 %v181_v33 }
 0x247   :  { %v183_v37 = vpop.xlane.xlu1 %182 }
 0x248   :  { %v188_v38 = vrot.slane %v183_v37, %v187_v35  ;;  %v192_v39 = vrot.slane %v183_v37, %v191_v36 }
 0x24a   :  { %318 = vrcp.f32 %v188_v38 }
 0x24b   :  { %320 = vrcp.f32 %v192_v39 }
 0x254   :  { %v319_v40 = vpop.eup %318 }
 0x255   :  { %v321_v41 = vpop.eup %320  ;;  %v196_v42 = vmul.f32 %v319_v40, %v315_v28 }
 0x256   :  { %v198_v43 = vmul.f32 %v321_v41, %v317_v29 }
 0x257   :  { %201 = vperm.xlu1 %308, %v196_v42  }
 0x258   :  { %206 = vperm.xlu0 %309, %v198_v43  }
 0x2d6   :  { %v202_v44 = vpop.permute.xlu1 %201 }
 0x2d7   :  { %v207_v45 = vpop.permute.xlu0 %206  ;;  %v209_v46 = vmul.f32 %v202_v44, %v479_v5  ;;  %v234_v47 = vrot.slane %v202_v44, %v171_v27 }
 0x2d8   :  { %v210_v48 = vmul.f32 %v207_v45, %v50_v7  ;;  %v238_v49 = vrot.slane %v207_v45, %v171_v27 }
 0x2d9   :  { %v211_v50 = vsel %vm63_vm0, %v209_v46, 0.0 }
 0x2da   :  { %v218_v51 = vsel %vm63_vm0, %v210_v48, 0.0  ;;  %v212_v52 = vrot.slane %v211_v50, 4  ;;  %v239_v53 = vsel %vm177_vm1, %v238_v49, %v234_v47 }
 0x2db   :  { %v219_v54 = vrot.slane %v218_v51, 4  ;;  %241 = vst.msk [vmem:[#allocation8] sm:$0x3] %vm180_vm2, %v239_v53 }
 0x2dc   :  { %v213_v55 = vadd.f32 %v212_v52, %v211_v50 }
 0x2dd   :  { %377 = shalt.err (!%p374_p6)
}
 0x2de   :  { %s378_s24 = scalar_lea.hbm %s529_s5, 32 }
 0x2df   :  { %p379_p7 = scmp.ne.s32.totalorder %s529_s5, %s378_s24  ;;  %p382_p8 = scmp.lt.u32.totalorder %s378_s24, %s529_s5 }
 0x2e1   :  { %p384_p9 = pnand %p382_p8, %p379_p7 }
 0x2e3   :  { %387 = shalt.err (!%p384_p9)
}
 0x2e4   :  { %261 = dma.vmem_to_hbm [thread:$0]  %s259_s3, 32, %s529_s5, [#allocation9]   ;;  %v220_v56 = vadd.f32 %v219_v54, %v218_v51  ;;  %v214_v57 = vrot.slane %v213_v55, 2  ;;  %vm229_vm3 = vcmask 254976  }
 0x2e5   :  { %s424_s6 = smov [#allocation7]  }
 0x2e6   :  { %v221_v58 = vrot.slane %v220_v56, 2  ;;  %v215_v59 = vadd.f32 %v214_v57, %v213_v55  ;;  %s248_s7 = sshll.u32 %s424_s6, 4  ;;  %s249_s7 = int_to_ptr.vmem [resolvable:$true] %s248_s7 }
 0x2e7   :  { %s388_s8 = scalar_lea.vmem %s249_s7, 32  ;;  %p393_p11 = scmp.lt.s32.totalorder %s249_s7, %s249_s7 }
 0x2e8   :  { %v222_v60 = vadd.f32 %v221_v58, %v220_v56  ;;  %v216_v61 = vrot.slane %v215_v59, 1  ;;  %p389_p10 = scmp.ne.s32.totalorder %s249_s7, %s388_s8  ;;  %p394_p12 = scmp.lt.s32.totalorder %s388_s8, %s388_s8 }
 0x2ea   :  { %v223_v62 = vrot.slane %v222_v60, 1  ;;  %v217_v63 = vadd.f32 %v216_v61, %v215_v59  ;;  %p395_p13 = por %p394_p12, %p393_p11 }
 0x2ec   :  { %v224_v0 = vadd.f32 %v223_v62, %v222_v60  ;;  %p396_p0 = pnand %p395_p13, %p389_p10 }
 0x2ee   :  { %v227_v1 = vsel %vm177_vm1, %v224_v0, %v217_v63 }
 0x2ef   :  { %230 = vst.msk [vmem:[#allocation7] sm:$0x3] %vm229_vm3, %v227_v1 }
 0x2f0   :  { %399 = shalt.err (!%p396_p0)
}
 0x2f1   :  { %s400_s10 = scalar_lea.hbm %s528_s4, 32 }
 0x2f2   :  { %p401_p1 = scmp.ne.s32.totalorder %s528_s4, %s400_s10  ;;  %p404_p2 = scmp.lt.u32.totalorder %s400_s10, %s528_s4 }
 0x2f4   :  { %p406_p3 = pnand %p404_p2, %p401_p1 }
 0x2f6   :  { %409 = shalt.err (!%p406_p3)
}
 0x2f7   :  { %251 = dma.vmem_to_hbm [thread:$0]  %s249_s7, 32, %s528_s4, [#allocation4]  }
 0x2f8   :  { %414 = dma.done.wait [#allocation4], 32  }
 0x2f9   :  { %415 = vsyncadd [#allocation4], 4294967264 }
 0x2fa   :  { %416 = dma.done.wait [#allocation9], 32  }
 0x2fb   :  { %417 = vsyncadd [#allocation9], 4294967264 }
 0x2fc   :  { %268 = vsyncpa [#allocation3], 1 }
 0x2fd   :  { %269 = vsyncpa [#allocation6], 1 }
 0x2fe   :  { %270 = vsyncpa [#allocation4], 1 }
 0x2ff   :  { %271 = vsyncpa [#allocation9], 1 }

</bundles_post_ra>
